<compile_context>
chip_gen: v7x
topology: tpu7x:2x2x1
jax: 0.10.0
libtpu: 0.0.40
codegen_flags: <defaults>
</compile_context>

<pallas_src>
import math

import numpy as np
import jax
import jax.numpy as jnp
from jax.experimental import pallas as pl
from jax.experimental.pallas import tpu as pltpu


# ------------------------------ tiling helpers ------------------------------

ROW_TILE_MAX = 256          # rows per block  (sublane axis)
LANE_TILE_MAX = 512         # output columns per block (lane axis)
K_TILE_MAX = 512            # contraction columns per block
ROW_ALIGN = 16              # safe sublane alignment for bf16/f32 blocks
VMEM_LIMIT_BYTES = 32 * 1024 * 1024   # fits v5e / v6e / v7x with headroom


def _round_up(v, m):
    return -(-v // m) * m


def _pad_and_tile(dim, max_tile, align):
    """Return (padded_dim, tile) with tile | padded_dim and tile % align == 0."""
    if dim <= max_tile:
        tile = _round_up(dim, align)
        return tile, tile
    return _round_up(dim, max_tile), max_tile


def _pad2(a, rows, cols):
    r, c = a.shape
    if (r, c) == (rows, cols):
        return a
    return jnp.pad(a, ((0, rows - r), (0, cols - c)))


# ------------------------------ Pallas kernels ------------------------------

def _matmul_kernel(x_ref, w_ref, o_ref, acc_ref):
    """One (tm, tn) tile of x @ w, accumulated over the k grid axis (f32 acc)."""
    k = pl.program_id(2)

    @pl.when(k == 0)
    def _init():
        acc_ref[...] = jnp.zeros_like(acc_ref)

    acc_ref[...] += jnp.dot(x_ref[...], w_ref[...],
                            preferred_element_type=jnp.float32)

    @pl.when(k == pl.num_programs(2) - 1)
    def _store():
        o_ref[...] = acc_ref[...].astype(o_ref.dtype)


def _tail_kernel(x_ref, wp_ref, wo_ref, o_ref, h_ref):
    """Fused (x @ wp) @ wo: h built once per row block (j==0) into VMEM scratch,
    second matmul tiled over the cluster-vocab (j) axis."""
    j = pl.program_id(1)
    k = pl.program_id(2)

    @pl.when(j == 0)
    def _build_h():
        @pl.when(k == 0)
        def _init():
            h_ref[...] = jnp.zeros_like(h_ref)

        h_ref[...] += jnp.dot(x_ref[...], wp_ref[...],
                              preferred_element_type=jnp.float32)

    @pl.when(k == pl.num_programs(2) - 1)
    def _store():
        o_ref[...] = jnp.dot(h_ref[...].astype(wo_ref.dtype), wo_ref[...],
                             preferred_element_type=jnp.float32
                             ).astype(o_ref.dtype)


# ------------------------------ kernel wrappers ------------------------------

def pallas_linear(x, w_t, out_dtype=jnp.float32):
    """y = x @ w_t with x:(N, D), w_t:(D, O)  (w_t = W.T of an F.linear weight)."""
    N, D = x.shape
    Dw, O = w_t.shape
    assert D == Dw, (D, Dw)
    N_pad, tm = _pad_and_tile(N, ROW_TILE_MAX, ROW_ALIGN)
    D_pad, tk = _pad_and_tile(D, K_TILE_MAX, 128)
    O_pad, tn = _pad_and_tile(O, LANE_TILE_MAX, 128)
    x = _pad2(x, N_pad, D_pad)
    w_t = _pad2(w_t, D_pad, O_pad)

    in_b = x.dtype.itemsize
    out_b = jnp.dtype(out_dtype).itemsize
    cost = pl.CostEstimate(
        flops=2 * N_pad * D_pad * O_pad,
        transcendentals=0,
        bytes_accessed=(N_pad * D_pad + D_pad * O_pad) * in_b + N_pad * O_pad * out_b)

    out = pl.pallas_call(
        _matmul_kernel,
        out_shape=jax.ShapeDtypeStruct((N_pad, O_pad), out_dtype),
        grid=(N_pad // tm, O_pad // tn, D_pad // tk),
        in_specs=[
            pl.BlockSpec((tm, tk), lambda i, j, k: (i, k)),
            pl.BlockSpec((tk, tn), lambda i, j, k: (k, j)),
        ],
        out_specs=pl.BlockSpec((tm, tn), lambda i, j, k: (i, j)),
        scratch_shapes=[pltpu.VMEM((tm, tn), jnp.float32)],
        compiler_params=pltpu.CompilerParams(
            dimension_semantics=("parallel", "parallel", "arbitrary"),
            vmem_limit_bytes=VMEM_LIMIT_BYTES),
        cost_estimate=cost,
    )(x, w_t)
    return out[:N, :O]


def pallas_tail(x, wp_t, wo_t, out_dtype=jnp.float32):
    """y = (x @ wp_t) @ wo_t   (proj -> dropout(p=0, identity) -> out), fused."""
    N, D = x.shape
    Dw, H = wp_t.shape
    Hw, V = wo_t.shape
    assert D == Dw and H == Hw
    N_pad, tm = _pad_and_tile(N, ROW_TILE_MAX, ROW_ALIGN)
    D_pad, tk = _pad_and_tile(D, K_TILE_MAX, 128)
    H_pad = _round_up(H, 128)          # intermediate kept whole; it is small
    V_pad, tn = _pad_and_tile(V, LANE_TILE_MAX, 128)
    x = _pad2(x, N_pad, D_pad)
    wp_t = _pad2(wp_t, D_pad, H_pad)
    wo_t = _pad2(wo_t, H_pad, V_pad)

    in_b = x.dtype.itemsize
    out_b = jnp.dtype(out_dtype).itemsize
    cost = pl.CostEstimate(
        flops=2 * N_pad * D_pad * H_pad + 2 * N_pad * H_pad * V_pad,
        transcendentals=0,
        bytes_accessed=(N_pad * D_pad + D_pad * H_pad + H_pad * V_pad) * in_b
        + N_pad * V_pad * out_b)

    out = pl.pallas_call(
        _tail_kernel,
        out_shape=jax.ShapeDtypeStruct((N_pad, V_pad), out_dtype),
        grid=(N_pad // tm, V_pad // tn, D_pad // tk),
        in_specs=[
            pl.BlockSpec((tm, tk), lambda i, j, k: (i, k)),
            pl.BlockSpec((tk, H_pad), lambda i, j, k: (k, 0)),
            pl.BlockSpec((H_pad, tn), lambda i, j, k: (0, j)),
        ],
        out_specs=pl.BlockSpec((tm, tn), lambda i, j, k: (i, j)),
        scratch_shapes=[pltpu.VMEM((tm, H_pad), jnp.float32)],
        compiler_params=pltpu.CompilerParams(
            # h scratch carries across j, so only the row axis is parallel.
            dimension_semantics=("parallel", "arbitrary", "arbitrary"),
            vmem_limit_bytes=VMEM_LIMIT_BYTES),
        cost_estimate=cost,
    )(x, wp_t, wo_t)
    return out[:N, :V]


# --------------------------- AdaptiveSoftmax port ---------------------------

def _xavier_uniform(key, shape):
    fan_out, fan_in = shape
    a = math.sqrt(6.0 / (fan_in + fan_out))
    return jax.random.uniform(key, shape, jnp.float32, -a, a)


class AdaptiveSoftmaxPallas:
    """Pallas/TPU port of fairseq AdaptiveSoftmax.forward (eval semantics)."""

    def __init__(self, vocab_size, input_dim, cutoff, dropout=0.0, factor=4.0,
                 compute_dtype=jnp.bfloat16, key=None):
        if key is None:
            key = jax.random.PRNGKey(0)
        if vocab_size > cutoff[-1]:
            cutoff = cutoff + [vocab_size]
        else:
            assert vocab_size == cutoff[-1], \
                "cannot specify cutoff larger than vocab size"
        self.vocab_size = vocab_size
        self.cutoff = cutoff
        # TODO(synk): training-mode dropout (p>0) not implemented; eval semantics = identity.
        self.dropout = dropout
        self.input_dim = input_dim
        self.factor = factor
        self.compute_dtype = compute_dtype
        self.output_dim = cutoff[0] + len(cutoff) - 1

        keys = jax.random.split(key, 1 + 2 * (len(cutoff) - 1))

        # Reference (f32) parameters in torch (out, in) layout.
        self.head_w = _xavier_uniform(keys[0], (self.output_dim, input_dim))
        self.tail_proj = []
        self.tail_out = []
        for i in range(len(cutoff) - 1):
            dim = int(input_dim // factor ** (i + 1))
            v_i = cutoff[i + 1] - cutoff[i]
            self.tail_proj.append(_xavier_uniform(keys[1 + 2 * i], (dim, input_dim)))
            self.tail_out.append(_xavier_uniform(keys[2 + 2 * i], (v_i, dim)))

        # Kernel-side parameters: transposed to (in, out), zero-padded to
        # lane-aligned shapes, cast to the MXU compute dtype -- done once here
        # so the hot path never transposes or pads weights.
        self.d_pad, _ = _pad_and_tile(input_dim, K_TILE_MAX, 128)
        o_pad, _ = _pad_and_tile(self.output_dim, LANE_TILE_MAX, 128)
        self.head_w_t = _pad2(self.head_w.T.astype(compute_dtype), self.d_pad, o_pad)
        self.tail_proj_t = []
        self.tail_out_t = []
        for i in range(len(cutoff) - 1):
            dim = self.tail_proj[i].shape[0]
            v_i = self.tail_out[i].shape[0]
            h_pad = _round_up(dim, 128)
            v_pad, _ = _pad_and_tile(v_i, LANE_TILE_MAX, 128)
            self.tail_proj_t.append(
                _pad2(self.tail_proj[i].T.astype(compute_dtype), self.d_pad, h_pad))
            self.tail_out_t.append(
                _pad2(self.tail_out[i].T.astype(compute_dtype), h_pad, v_pad))

    def adapt_target(self, target):
        """Host-side replica of AdaptiveSoftmax.adapt_target (data-dependent shapes)."""
        target = np.asarray(target).reshape(-1)
        new_target = [target.copy()]
        target_idxs = []
        for i in range(len(self.cutoff) - 1):
            mask = (target >= self.cutoff[i]) & (target < self.cutoff[i + 1])
            new_target[0][mask] = self.cutoff[0] + i
            if mask.any():
                target_idxs.append(np.nonzero(mask)[0].astype(np.int32))
                new_target.append((target[mask] - self.cutoff[i]).astype(target.dtype))
            else:
                target_idxs.append(None)
                new_target.append(None)
        return new_target, target_idxs

    def forward(self, x, target):
        """x: (b, t, d) f32, target: (b, t) int -> (output list, new_target list)."""
        b, t, d = x.shape
        assert d == self.input_dim
        n_rows = b * t
        x2 = x.reshape(n_rows, d)
        # F.dropout(training=False) == identity (eval semantics).
        xc = _pad2(x2.astype(self.compute_dtype), n_rows, self.d_pad)

        new_target, target_idxs = self.adapt_target(target)

        head_full = pallas_linear(xc, self.head_w_t)            # (n_rows, o_pad) f32
        output = [head_full[:, :self.output_dim]]

        for i, idxs in enumerate(target_idxs):
            if idxs is None:
                output.append(None)
                continue
            n = int(idxs.shape[0])
            v_i = self.cutoff[i + 1] - self.cutoff[i]
            # Bucket the gathered row count to a power of two (>= 16): bounded
            # set of tail shapes (no per-n recompiles); gather stays on device.
            n_bucket = max(16, int(pl.next_power_of_2(n)))
            idx_pad = np.zeros((n_bucket,), np.int32)
            idx_pad[:n] = idxs
            x_sel = jnp.take(xc, jnp.asarray(idx_pad), axis=0)  # index_select on device
            tail_full = pallas_tail(x_sel, self.tail_proj_t[i], self.tail_out_t[i])
            output.append(tail_full[:n, :v_i])

        new_target = [jnp.asarray(v) if v is not None else None for v in new_target]
        return output, new_target


# ---------------------------------- main ------------------------------------

if __name__ == "__main__":
    key = jax.random.PRNGKey(0)
    k_x, k_t, k_w = jax.random.split(key, 3)

    b, t, d = 2, 8, 32
    vocab_size = 48
    cutoff = [16, 32]

    x = jax.random.normal(k_x, (b, t, d), dtype=jnp.float32)
    target = jax.random.randint(k_t, (b, t), 0, vocab_size, dtype=jnp.int32)

    model = AdaptiveSoftmaxPallas(vocab_size, d, cutoff, dropout=0.0,
                                  factor=4.0, key=k_w)

    output, new_target = model.forward(x, target)

    for o in output:
        if o is not None:
            jax.block_until_ready(o)

    # ------------------ sanity check vs. bf16-emulating reference ------------------
    def to_bf16_f32(a):
        return np.asarray(jnp.asarray(a).astype(jnp.bfloat16).astype(jnp.float32))

    x2 = np.asarray(x.reshape(-1, d), dtype=np.float32)
    xb = to_bf16_f32(x2)
    ref_head = xb @ to_bf16_f32(model.head_w).T
    np.testing.assert_allclose(np.asarray(output[0]), ref_head, atol=2e-2, rtol=2e-2)

    _, target_idxs = model.adapt_target(target)
    for i, idxs in enumerate(target_idxs):
        if idxs is None:
            assert output[i + 1] is None
            continue
        xs = xb[idxs]
        h = xs @ to_bf16_f32(model.tail_proj[i]).T
        ref = to_bf16_f32(h) @ to_bf16_f32(model.tail_out[i]).T
        np.testing.assert_allclose(np.asarray(output[i + 1]), ref, atol=2e-2, rtol=2e-2)

    print("KERNEL_OK")
</pallas_src>

<mosaic_0001>
module attributes {stable_mosaic.version = 11 : i64} {
  func.func @_matmul_kernel(%arg0: i32, %arg1: i32, %arg2: i32, %arg3: memref<16x128xbf16, #tpu.memory_space<vmem>>, %arg4: memref<128x128xbf16, #tpu.memory_space<vmem>>, %arg5: memref<16x128xf32, #tpu.memory_space<vmem>>, %arg6: memref<16x128xf32, #tpu.memory_space<vmem>>) attributes {dimension_semantics = [#tpu.dimension_semantics<parallel>, #tpu.dimension_semantics<parallel>, #tpu.dimension_semantics<arbitrary>], iteration_bounds = array<i64: 1, 1, 1>, scalar_prefetch = 0 : i64, scratch_operands = 1 : i64, tpu.core_type = #tpu.core_type<tc>, window_params = [{transform_indices = @transform_0, window_bounds = array<i64: 16, 128>}, {transform_indices = @transform_1, window_bounds = array<i64: 128, 128>}, {transform_indices = @transform_2, window_bounds = array<i64: 16, 128>}]} {
    %c0_i32 = arith.constant 0 : i32
    %0 = arith.cmpi eq, %arg2, %c0_i32 : i32
    %1 = arith.extui %0 : i1 to i32
    %c0_i32_0 = arith.constant 0 : i32
    %2 = arith.cmpi ne, %1, %c0_i32_0 : i32
    scf.if %2 {
      %cst_10 = arith.constant 0.000000e+00 : f32
      %12 = vector.broadcast %cst_10 : f32 to vector<16x128xf32>
      %c0_11 = arith.constant 0 : index
      %c0_12 = arith.constant 0 : index
      %13 = vector.load %arg6[%c0_11, %c0_12] : memref<16x128xf32, #tpu.memory_space<vmem>>, vector<16x128xf32>
      tpu.vector_store %arg6[%c0_11, %c0_12], %12 {strides = array<i32>} : memref<16x128xf32, #tpu.memory_space<vmem>>, vector<16x128xf32>,
    } else {
    }
    %c0 = arith.constant 0 : index
    %c0_1 = arith.constant 0 : index
    %3 = vector.load %arg6[%c0, %c0_1] : memref<16x128xf32, #tpu.memory_space<vmem>>, vector<16x128xf32>
    %c0_2 = arith.constant 0 : index
    %c0_3 = arith.constant 0 : index
    %4 = vector.load %arg3[%c0_2, %c0_3] : memref<16x128xbf16, #tpu.memory_space<vmem>>, vector<16x128xbf16>
    %c0_4 = arith.constant 0 : index
    %c0_5 = arith.constant 0 : index
    %5 = vector.load %arg4[%c0_4, %c0_5] : memref<128x128xbf16, #tpu.memory_space<vmem>>, vector<128x128xbf16>
    %cst = arith.constant dense<0.000000e+00> : vector<16x128xf32>
    %6 = tpu.matmul %4, %5, %cst {dimension_numbers = #tpu.dot_dimension_numbers<[1], [0], [0], [1], [0, 0, 1, 1], [], []>} : vector<16x128xbf16>, vector<128x128xbf16>, vector<16x128xf32> -> vector<16x128xf32>
    %7 = arith.addf %3, %6 : vector<16x128xf32>
    %c0_6 = arith.constant 0 : index
    %c0_7 = arith.constant 0 : index
    %8 = vector.load %arg6[%c0_6, %c0_7] : memref<16x128xf32, #tpu.memory_space<vmem>>, vector<16x128xf32>
    tpu.vector_store %arg6[%c0_6, %c0_7], %7 {strides = array<i32>} : memref<16x128xf32, #tpu.memory_space<vmem>>, vector<16x128xf32>,
    %c0_i32_8 = arith.constant 0 : i32
    %9 = arith.cmpi eq, %arg2, %c0_i32_8 : i32
    %10 = arith.extui %9 : i1 to i32
    %c0_i32_9 = arith.constant 0 : i32
    %11 = arith.cmpi ne, %10, %c0_i32_9 : i32
    scf.if %11 {
      %c0_10 = arith.constant 0 : index
      %c0_11 = arith.constant 0 : index
      %12 = vector.load %arg6[%c0_10, %c0_11] : memref<16x128xf32, #tpu.memory_space<vmem>>, vector<16x128xf32>
      %c0_12 = arith.constant 0 : index
      %c0_13 = arith.constant 0 : index
      %13 = vector.load %arg5[%c0_12, %c0_13] : memref<16x128xf32, #tpu.memory_space<vmem>>, vector<16x128xf32>
      tpu.vector_store %arg5[%c0_12, %c0_13], %12 {strides = array<i32>} : memref<16x128xf32, #tpu.memory_space<vmem>>, vector<16x128xf32>,
    } else {
    }
    return
  }
  func.func @transform_0(%arg0: i32, %arg1: i32, %arg2: i32) -> (i32, i32) {
    %c0_i32 = arith.constant 0 : i32
    return %arg0, %arg2 : i32, i32
  }
  func.func @transform_1(%arg0: i32, %arg1: i32, %arg2: i32) -> (i32, i32) {
    %c0_i32 = arith.constant 0 : i32
    return %arg2, %arg1 : i32, i32
  }
  func.func @transform_2(%arg0: i32, %arg1: i32, %arg2: i32) -> (i32, i32) {
    %c0_i32 = arith.constant 0 : i32
    return %arg0, %arg1 : i32, i32
  }
}

</mosaic_0001>

<bundles_post_ra>
// kernel: tpu_custom_call.1
= control target key start
LH: loop header
LB: loop body
LE: loop exit
PB: predicated region body
PF: predicated region fallthrough
CT: control target
= control target key end

     0   :  { %7 = vsyncpa [#allocation4], 0  ;;  %s379_s0 = inlined_call_operand.hbm [shape: bf16[16,128], index: 0, kind: input, shape index: {}]   ;;  %s380_s1 = inlined_call_operand.hbm [shape: bf16[128,128], index: 1, kind: input, shape index: {}]   ;;  %s381_s2 = inlined_call_operand.hbm [shape: f32[16,128], index: 2, kind: output, shape index: {}]  }
   0x1   :  { %8 = vsyncpa [#allocation7], 0 }
   0x2   :  { %9 = vsyncpa [#allocation5], 0  ;;  %s319_s9 = smov [#allocation3]   ;;  %s247_s13 = scalar_lea.hbm %s379_s0, 128 }
   0x3   :  { %s15_s10 = sshll.u32 %s319_s9, 4  ;;  %p248_p0 = scmp.ne.s32.totalorder %s379_s0, %s247_s13  ;;  %s16_s10 = int_to_ptr.vmem [resolvable:$true] %s15_s10 }
   0x4   :  { %p251_p1 = scmp.lt.u32.totalorder %s247_s13, %s379_s0 }
   0x6   :  { %p253_p2 = pnand %p251_p1, %p248_p0 }
   0x8   :  { %256 = shalt.err (!%p253_p2)
}
   0x9   :  { %s257_s18 = scalar_lea.vmem %s16_s10, 128  ;;  %p262_p4 = scmp.lt.s32.totalorder %s16_s10, %s16_s10 }
   0xa   :  { %p258_p3 = scmp.ne.s32.totalorder %s16_s10, %s257_s18  ;;  %p263_p5 = scmp.lt.s32.totalorder %s257_s18, %s257_s18 }
   0xc   :  { %p264_p6 = por %p263_p5, %p262_p4 }
   0xe   :  { %p265_p7 = pnand %p264_p6, %p258_p3 }
  0x10   :  { %268 = shalt.err (!%p265_p7)
}
  0x11   :  { %s320_s19 = smov 64   ;;  %s321_s20 = smov 4  }
  0x12   :  { %21 = dma.hbm_to_vmem [thread:$0]  %s379_s0, 128, %s16_s10, [#allocation4], %s320_s19, %s320_s19, %s321_s20  }
  0x13   :  { %s322_s23 = smov [#allocation6]   ;;  %s269_s27 = scalar_lea.hbm %s380_s1, 1024 }
  0x14   :  { %s27_s24 = sshll.u32 %s322_s23, 4  ;;  %p270_p8 = scmp.ne.s32.totalorder %s380_s1, %s269_s27  ;;  %s28_s24 = int_to_ptr.vmem [resolvable:$true] %s27_s24 }
  0x15   :  { %p273_p9 = scmp.lt.u32.totalorder %s269_s27, %s380_s1 }
  0x17   :  { %p275_p10 = pnand %p273_p9, %p270_p8 }
  0x19   :  { %278 = shalt.err (!%p275_p10)
}
  0x1a   :  { %s279_s4 = scalar_lea.vmem %s28_s24, 1024  ;;  %p284_p12 = scmp.lt.s32.totalorder %s28_s24, %s28_s24 }
  0x1b   :  { %p280_p11 = scmp.ne.s32.totalorder %s28_s24, %s279_s4  ;;  %p285_p13 = scmp.lt.s32.totalorder %s279_s4, %s279_s4 }
  0x1d   :  { %p286_p0 = por %p285_p13, %p284_p12 }
  0x1f   :  { %p287_p1 = pnand %p286_p0, %p280_p11 }
  0x21   :  { %290 = shalt.err (!%p287_p1)
}
  0x22   :  { %33 = dma.hbm_to_vmem [thread:$0]  %s380_s1, 1024, %s28_s24, [#allocation7], %s320_s19, %s320_s19, %s321_s20  }
  0x23   :  { %313 = dma.done.wait [#allocation4], 128  }
  0x24   :  { %314 = vsyncadd [#allocation4], 4294967168 }
  0x25   :  { %315 = dma.done.wait [#allocation7], 1024  }
  0x26   :  { %316 = vsyncadd [#allocation7], 4294966272  ;;  %v323_v0 = vmov 0.0   ;;  %vm324_vm0 = vmmov 0   ;;  %v238_v1 = vld [vmem:[#allocation6] sm:$0xff]   ;;  %v239_v2 = vld [vmem:[#allocation6 + $0x8] sm:$0xff]  }
  0x27   :  { %209 = vmatprep.subr.bf16.mxu0 %v323_v0  ;;  %225 = vmatprep.mubr.msk.bf16.mxu0 %vm324_vm0, %v323_v0  ;;  %v240_v3 = vld [vmem:[#allocation6 + $0x10] sm:$0xff]   ;;  %v241_v4 = vld [vmem:[#allocation6 + $0x18] sm:$0xff]   ;;  %v242_v5 = vld [vmem:[#allocation6 + $0x20] sm:$0xff]   ;;  %s325_s1 = smov [#allocation8]  }
  0x28   :  { %210 = vmatpush3.bf16.msra.mxu0 %v238_v1  ;;  %v243_v6 = vld [vmem:[#allocation6 + $0x28] sm:$0xff]   ;;  %v244_v7 = vld [vmem:[#allocation6 + $0x30] sm:$0xff]   ;;  %v245_v8 = vld [vmem:[#allocation6 + $0x38] sm:$0xff]   ;;  %s178_s6 = sshll.u32 %s325_s1, 4  ;;  %s179_s6 = int_to_ptr.vmem [resolvable:$true] %s178_s6 }
  0x29   :  { %211 = vmatprep.subr.bf16.mxu0 %v323_v0  ;;  %v246_v9 = vld [vmem:[#allocation3] sm:$0xff]   ;;  %s291_s7 = scalar_lea.vmem %s179_s6, 256  ;;  %p296_p3 = scmp.lt.s32.totalorder %s179_s6, %s179_s6 }
  0x2a   :  { %p292_p2 = scmp.ne.s32.totalorder %s179_s6, %s291_s7  ;;  %p297_p4 = scmp.lt.s32.totalorder %s291_s7, %s291_s7 }
  0x2c   :  { %212 = vmatpush3.bf16.msra.mxu0 %v239_v2  ;;  %p298_p5 = por %p297_p4, %p296_p3 }
  0x2d   :  { %213 = vmatprep.subr.bf16.mxu0 %v323_v0 }
  0x2e   :  { %p299_p6 = pnand %p298_p5, %p292_p2 }
  0x30   :  { %214 = vmatpush3.bf16.msra.mxu0 %v240_v3 }
  0x31   :  { %215 = vmatprep.subr.bf16.mxu0 %v323_v0 }
  0x34   :  { %216 = vmatpush3.bf16.msra.mxu0 %v241_v4 }
  0x35   :  { %217 = vmatprep.subr.bf16.mxu0 %v323_v0 }
  0x38   :  { %218 = vmatpush3.bf16.msra.mxu0 %v242_v5 }
  0x39   :  { %219 = vmatprep.subr.bf16.mxu0 %v323_v0 }
  0x3c   :  { %220 = vmatpush3.bf16.msra.mxu0 %v243_v6 }
  0x3d   :  { %221 = vmatprep.subr.bf16.mxu0 %v323_v0 }
  0x40   :  { %222 = vmatpush3.bf16.msra.mxu0 %v244_v7 }
  0x41   :  { %223 = vmatprep.subr.bf16.mxu0 %v323_v0 }
  0x44   :  { %224 = vmatpush3.bf16.msra.mxu0 %v245_v8 }
  0x47   :  { %226 = vmatmul.mubr.bf16.vlgmr.msra.gmra.mrb[0].mxu0 %v246_v9 }
 0x11a   :  { %v155_v10 = vpop.f32.mrb[0].mxu0 }
 0x11b   :  { %171 = vst [vmem:[#allocation8] sm:$0xff] %v155_v10  ;;  %v227_v11 = vpop.f32.mrb[1].mxu0 }
 0x11c   :  { %v158_v12 = vpop.f32.mrb[2].mxu0 }
 0x11d   :  { %172 = vst [vmem:[#allocation8 + $0x8] sm:$0xff] %v158_v12  ;;  %v228_v13 = vpop.f32.mrb[3].mxu0 }
 0x11e   :  { %302 = shalt.err (!%p299_p6)
}
 0x11f   :  { %s303_s10 = scalar_lea.hbm %s381_s2, 256 }
 0x120   :  { %p304_p7 = scmp.ne.s32.totalorder %s381_s2, %s303_s10  ;;  %p307_p8 = scmp.lt.u32.totalorder %s303_s10, %s381_s2 }
 0x122   :  { %p309_p9 = pnand %p307_p8, %p304_p7 }
 0x124   :  { %312 = shalt.err (!%p309_p9)
}
 0x125   :  { %s326_s15 = smov 128   ;;  %s327_s16 = smov 8  }
 0x126   :  { %184 = dma.vmem_to_hbm [thread:$0]  %s179_s6, 256, %s381_s2, [#allocation5], %s326_s15, %s326_s15, %s327_s16  }
 0x127   :  { %317 = dma.done.wait [#allocation5], 256  }
 0x128   :  { %318 = vsyncadd [#allocation5], 4294967040 }
 0x129   :  { %188 = vsyncpa [#allocation4], 1 }
 0x12a   :  { %189 = vsyncpa [#allocation7], 1 }
 0x12b   :  { %190 = vsyncpa [#allocation5], 1 }

</bundles_post_ra>
